<compile_context>
chip_gen: v7x
topology: tpu7x:2x2x1
jax: 0.10.0
libtpu: 0.0.40
codegen_flags: <defaults>
</compile_context>

<pallas_src>
import functools

import jax
import jax.numpy as jnp
from jax.experimental import pallas as pl
from jax.experimental.pallas import tpu as pltpu


# ----------------------------------------------------------------------------
# Kernel: Re(text * select) -> mean over s -> (tb, D) @ (D, D) + bias
# ----------------------------------------------------------------------------
def _gate_kernel(tr_ref, ti_ref, sr_ref, si_ref, w_ref, b_ref, o_ref, acc_ref,
                 *, inv_s):
    # grid = (batch_tiles, s_tiles); axis 1 is the reduction ("arbitrary") axis.
    k = pl.program_id(1)

    @pl.when(k == 0)
    def _():
        acc_ref[...] = jnp.zeros_like(acc_ref)

    # Re((tr + i*ti) * (sr + i*si)) = tr*sr - ti*si, reduced over this s tile.
    # VPU multiplies + XLU cross-sublane reduce: both off the HBM critical path.
    acc_ref[...] += jnp.sum(tr_ref[...] * sr_ref[...] - ti_ref[...] * si_ref[...],
                            axis=1)                                   # (tb, D)

    @pl.when(k == pl.num_programs(1) - 1)
    def _():
        g = acc_ref[...] * inv_s                                      # mean == AvgPool1d(s)
        # Conv1d(kernel=1) == batched linear: one (tb, D) @ (D, D) MXU pass.
        o_ref[...] = (jnp.dot(g, w_ref[...], preferred_element_type=jnp.float32)
                      + b_ref[...]).astype(o_ref.dtype)


# ----------------------------------------------------------------------------
# Tiling helpers
# ----------------------------------------------------------------------------
_X_BLOCK_TARGET = 3 * 1024 * 1024      # per-input, per-buffer x-block bytes


def _pick_tile(n, cap, mult=8):
    """Largest divisor of n that is <= cap and a multiple of `mult`.
    Falls back to n (whole axis, always layout-legal) if none exists."""
    if n <= cap:
        return n
    for d in range(min(cap, n), 0, -1):
        if n % d == 0 and d % mult == 0:
            return d
    return n


def _check_tile(name, tile, n):
    if tile == n:
        return
    if n % tile != 0 or tile % 8 != 0:
        raise ValueError(
            f"{name}={tile} must divide {n} and be a multiple of 8 "
            f"(or equal the full extent {n}).")


# ----------------------------------------------------------------------------
# Wrappers
# ----------------------------------------------------------------------------
def text2image_gate_parts(text_re, text_im, select_para, conv_w, conv_b,
                          *, s_tile=None, b_tile=None):
    """Core entry point taking separate real/imag planes (no extraction pass).

    text_re/text_im: float (B, S, D)
    select_para:     float32 (S, D, 2)  -- complex select parameter (real, imag)
    conv_w:          float32 (D, D)     -- Conv1d(k=1) weight, (out, in)
    conv_b:          float32 (D,)       -- Conv1d bias
    returns:         float32 (B, 1, D)
    """
    B, S, D = text_re.shape
    itemsize = 4

    tr = text_re.astype(jnp.float32)
    ti = text_im.astype(jnp.float32)
    sel_r = select_para[..., 0].astype(jnp.float32)          # (S, D), tiny
    sel_i = select_para[..., 1].astype(jnp.float32)          # (S, D), tiny
    w_t = conv_w.T.astype(jnp.float32)                       # (in, out): out = g @ w_t + b
    bias = conv_b.reshape(1, D).astype(jnp.float32)

    # ---- VMEM-budget-aware tile selection ---------------------------------
    if b_tile is None:
        cap_b = B
        if B >= 16:
            cap_b = max(8, B // 2)        # >=2 "parallel" steps -> v7x 2-TC sharding
        cap_b = min(cap_b, max(8, _X_BLOCK_TARGET // (8 * D * itemsize)))
        b_tile = _pick_tile(B, cap_b)
    else:
        _check_tile("b_tile", b_tile, B)

    if s_tile is None:
        cap_s = max(8, _X_BLOCK_TARGET // (b_tile * D * itemsize))
        s_tile = _pick_tile(S, cap_s)
    else:
        _check_tile("s_tile", s_tile, S)

    grid = (B // b_tile, S // s_tile)

    # Conservative VMEM estimate (double-buffered inputs + reduce temporaries).
    blk = b_tile * s_tile * D * itemsize
    est = (4 * blk                       # tr + ti, double-buffered
           + 2 * blk                     # elementwise-product temporaries of the reduce
           + 4 * s_tile * D * itemsize   # sel_r + sel_i, double-buffered
           + 2 * D * D * itemsize        # weight (worst case: double-buffered)
           + 4 * D * itemsize            # bias
           + b_tile * D * itemsize       # accumulator scratch
           + 2 * b_tile * D * itemsize)  # output, double-buffered
    vmem_limit = int(min(48 * 2**20, max(32 * 2**20, (est * 3) // 2)))

    def _build(single_buffer_invariants):
        # Grid-invariant operands (weight / bias) never get re-fetched; single
        # buffer them to free VMEM for bigger x tiles when supported.
        inv_kwargs = ({"pipeline_mode": pl.Buffered(1)}
                      if single_buffer_invariants else {})
        return pl.pallas_call(
            functools.partial(_gate_kernel, inv_s=1.0 / float(S)),
            out_shape=jax.ShapeDtypeStruct((B, D), jnp.float32),
            grid_spec=pltpu.PrefetchScalarGridSpec(
                num_scalar_prefetch=0,
                grid=grid,
                in_specs=[
                    pl.BlockSpec((b_tile, s_tile, D), lambda bi, sj: (bi, sj, 0)),
                    pl.BlockSpec((b_tile, s_tile, D), lambda bi, sj: (bi, sj, 0)),
                    pl.BlockSpec((s_tile, D), lambda bi, sj: (sj, 0)),
                    pl.BlockSpec((s_tile, D), lambda bi, sj: (sj, 0)),
                    pl.BlockSpec((D, D), lambda bi, sj: (0, 0), **inv_kwargs),
                    pl.BlockSpec((1, D), lambda bi, sj: (0, 0), **inv_kwargs),
                ],
                out_specs=pl.BlockSpec((b_tile, D), lambda bi, sj: (bi, 0)),
                scratch_shapes=[pltpu.VMEM((b_tile, D), jnp.float32)],
            ),
            compiler_params=pltpu.CompilerParams(
                dimension_semantics=("parallel", "arbitrary"),
                vmem_limit_bytes=vmem_limit),
        )

    # NOTE: eager call; the fallback guards Pallas versions / lowerings that
    # reject pipeline_mode=pl.Buffered(1) on a BlockSpec.
    try:
        out2d = _build(True)(tr, ti, sel_r, sel_i, w_t, bias)
        jax.block_until_ready(out2d)
    except Exception:
        out2d = _build(False)(tr, ti, sel_r, sel_i, w_t, bias)

    return out2d[:, None, :]                                   # match PyTorch (B, 1, D)


def text2image_gate(text_c, select_para, conv_w, conv_b, *, s_tile=None, b_tile=None):
    """PyTorch-equivalent entry point taking a complex (B, S, D) input.

    JAX cannot reinterpret a complex64 buffer as an f32 view
    (lax.bitcast_convert_type rejects complex), so real/imag extraction is one
    unavoidable XLA pass here; it is no longer followed by a jnp.stack copy.
    Callers that already hold separate real/imag planes should call
    text2image_gate_parts directly (zero extra HBM traffic).
    """
    return text2image_gate_parts(jnp.real(text_c), jnp.imag(text_c),
                                 select_para, conv_w, conv_b,
                                 s_tile=s_tile, b_tile=b_tile)


# ----------------------------------------------------------------------------
# Pure-JAX reference (mirrors the PyTorch module exactly)
# ----------------------------------------------------------------------------
def text2image_gate_ref(text_c, select_para, conv_w, conv_b):
    sel_c = select_para[..., 0] + 1j * select_para[..., 1]      # view_as_complex
    t = text_c * sel_c                                          # (B, s, D)
    pooled = jnp.mean(jnp.real(t), axis=1)                      # AvgPool1d(kernel=s)
    out = pooled @ conv_w.T + conv_b                            # Conv1d(k=1)
    return out[:, None, :]


if __name__ == "__main__":
    def make_inputs(key, B, S, D):
        k1, k2, k3, k4, k5 = jax.random.split(key, 5)
        tr = jax.random.normal(k1, (B, S, D), jnp.float32)
        ti = jax.random.normal(k2, (B, S, D), jnp.float32)
        text_c = tr + 1j * ti                                   # complex64 input
        select_para = jax.random.normal(k3, (S, D, 2), jnp.float32)
        conv_w = jax.random.normal(k4, (D, D), jnp.float32) * 0.05
        conv_b = jax.random.normal(k5, (D,), jnp.float32) * 0.05
        return text_c, select_para, conv_w, conv_b

    # Case 1: small shapes consistent with the module (grid collapses to 1 step).
    B, S, D = 2, 8, 32
    text_c, sel_p, w, b = make_inputs(jax.random.PRNGKey(0), B, S, D)
    out = text2image_gate(text_c, sel_p, w, b)
    jax.block_until_ready(out)
    ref = text2image_gate_ref(text_c, sel_p, w, b)
    assert out.shape == (B, 1, D)
    assert jnp.allclose(out, ref, rtol=1e-4, atol=1e-4), \
        f"max abs err = {float(jnp.max(jnp.abs(out - ref)))}"

    # Case 2: force a multi-step s reduction (exercises acc init/finalize + tiling).
    B2, S2, D2 = 8, 32, 32
    text_c2, sel_p2, w2, b2 = make_inputs(jax.random.PRNGKey(1), B2, S2, D2)
    out2 = text2image_gate(text_c2, sel_p2, w2, b2, s_tile=8)
    jax.block_until_ready(out2)
    ref2 = text2image_gate_ref(text_c2, sel_p2, w2, b2)
    assert out2.shape == (B2, 1, D2)
    assert jnp.allclose(out2, ref2, rtol=1e-4, atol=1e-4), \
        f"max abs err = {float(jnp.max(jnp.abs(out2 - ref2)))}"

    print("KERNEL_OK")
</pallas_src>

<mosaic_0001>
module attributes {stable_mosaic.version = 11 : i64} {
  func.func @_gate_kernel(%arg0: i32, %arg1: i32, %arg2: memref<2x8x32xf32, #tpu.memory_space<vmem>>, %arg3: memref<2x8x32xf32, #tpu.memory_space<vmem>>, %arg4: memref<8x32xf32, #tpu.memory_space<vmem>>, %arg5: memref<8x32xf32, #tpu.memory_space<vmem>>, %arg6: memref<32x32xf32, #tpu.memory_space<vmem>>, %arg7: memref<1x32xf32, #tpu.memory_space<vmem>>, %arg8: memref<2x32xf32, #tpu.memory_space<vmem>>, %arg9: memref<2x32xf32, #tpu.memory_space<vmem>>) attributes {dimension_semantics = [#tpu.dimension_semantics<parallel>, #tpu.dimension_semantics<arbitrary>], iteration_bounds = array<i64: 1, 1>, scalar_prefetch = 0 : i64, scratch_operands = 1 : i64, tpu.core_type = #tpu.core_type<tc>, window_params = [{transform_indices = @transform_0, window_bounds = array<i64: 2, 8, 32>}, {transform_indices = @transform_1, window_bounds = array<i64: 2, 8, 32>}, {transform_indices = @transform_2, window_bounds = array<i64: 8, 32>}, {transform_indices = @transform_3, window_bounds = array<i64: 8, 32>}, {pipeline_mode = #tpu.pipeline_mode<synchronous>, transform_indices = @transform_4, window_bounds = array<i64: 32, 32>}, {pipeline_mode = #tpu.pipeline_mode<synchronous>, transform_indices = @transform_5, window_bounds = array<i64: 1, 32>}, {transform_indices = @transform_6, window_bounds = array<i64: 2, 32>}]} {
    %c0_i32 = arith.constant 0 : i32
    %0 = arith.cmpi eq, %arg1, %c0_i32 : i32
    %1 = arith.extui %0 : i1 to i32
    %c0_i32_0 = arith.constant 0 : i32
    %2 = arith.cmpi ne, %1, %c0_i32_0 : i32
    scf.if %2 {
      %cst_16 = arith.constant 0.000000e+00 : f32
      %21 = vector.broadcast %cst_16 : f32 to vector<2x32xf32>
      %c0_17 = arith.constant 0 : index
      %c0_18 = arith.constant 0 : index
      %22 = vector.load %arg9[%c0_17, %c0_18] : memref<2x32xf32, #tpu.memory_space<vmem>>, vector<2x32xf32>
      tpu.vector_store %arg9[%c0_17, %c0_18], %21 {strides = array<i32>} : memref<2x32xf32, #tpu.memory_space<vmem>>, vector<2x32xf32>,
    } else {
    }
    %c0 = arith.constant 0 : index
    %c0_1 = arith.constant 0 : index
    %3 = vector.load %arg9[%c0, %c0_1] : memref<2x32xf32, #tpu.memory_space<vmem>>, vector<2x32xf32>
    %c0_2 = arith.constant 0 : index
    %c0_3 = arith.constant 0 : index
    %c0_4 = arith.constant 0 : index
    %4 = vector.load %arg2[%c0_2, %c0_3, %c0_4] : memref<2x8x32xf32, #tpu.memory_space<vmem>>, vector<2x8x32xf32>
    %c0_5 = arith.constant 0 : index
    %c0_6 = arith.constant 0 : index
    %5 = vector.load %arg4[%c0_5, %c0_6] : memref<8x32xf32, #tpu.memory_space<vmem>>, vector<8x32xf32>
    %6 = vector.shape_cast %5 : vector<8x32xf32> to vector<1x8x32xf32>
    %7 = vector.broadcast %6 : vector<1x8x32xf32> to vector<2x8x32xf32>
    %8 = arith.mulf %4, %7 : vector<2x8x32xf32>
    %c0_7 = arith.constant 0 : index
    %c0_8 = arith.constant 0 : index
    %c0_9 = arith.constant 0 : index
    %9 = vector.load %arg3[%c0_7, %c0_8, %c0_9] : memref<2x8x32xf32, #tpu.memory_space<vmem>>, vector<2x8x32xf32>
    %c0_10 = arith.constant 0 : index
    %c0_11 = arith.constant 0 : index
    %10 = vector.load %arg5[%c0_10, %c0_11] : memref<8x32xf32, #tpu.memory_space<vmem>>, vector<8x32xf32>
    %11 = vector.shape_cast %10 : vector<8x32xf32> to vector<1x8x32xf32>
    %12 = vector.broadcast %11 : vector<1x8x32xf32> to vector<2x8x32xf32>
    %13 = arith.mulf %9, %12 : vector<2x8x32xf32>
    %14 = arith.subf %8, %13 : vector<2x8x32xf32>
    %cst = arith.constant dense<0.000000e+00> : vector<2x32xf32>
    %15 = vector.multi_reduction <add>, %14, %cst [1] : vector<2x8x32xf32> to vector<2x32xf32>
    %16 = arith.addf %3, %15 : vector<2x32xf32>
    %c0_12 = arith.constant 0 : index
    %c0_13 = arith.constant 0 : index
    %17 = vector.load %arg9[%c0_12, %c0_13] : memref<2x32xf32, #tpu.memory_space<vmem>>, vector<2x32xf32>
    tpu.vector_store %arg9[%c0_12, %c0_13], %16 {strides = array<i32>} : memref<2x32xf32, #tpu.memory_space<vmem>>, vector<2x32xf32>,
    %c0_i32_14 = arith.constant 0 : i32
    %18 = arith.cmpi eq, %arg1, %c0_i32_14 : i32
    %19 = arith.extui %18 : i1 to i32
    %c0_i32_15 = arith.constant 0 : i32
    %20 = arith.cmpi ne, %19, %c0_i32_15 : i32
    scf.if %20 {
      %c0_16 = arith.constant 0 : index
      %c0_17 = arith.constant 0 : index
      %21 = vector.load %arg9[%c0_16, %c0_17] : memref<2x32xf32, #tpu.memory_space<vmem>>, vector<2x32xf32>
      %cst_18 = arith.constant 1.250000e-01 : f32
      %22 = vector.broadcast %cst_18 : f32 to vector<2x32xf32>
      %23 = arith.mulf %21, %22 : vector<2x32xf32>
      %c0_19 = arith.constant 0 : index
      %c0_20 = arith.constant 0 : index
      %24 = vector.load %arg6[%c0_19, %c0_20] : memref<32x32xf32, #tpu.memory_space<vmem>>, vector<32x32xf32>
      %cst_21 = arith.constant dense<0.000000e+00> : vector<2x32xf32>
      %25 = tpu.matmul %23, %24, %cst_21 {dimension_numbers = #tpu.dot_dimension_numbers<[1], [0], [0], [1], [0, 0, 1, 1], [], []>} : vector<2x32xf32>, vector<32x32xf32>, vector<2x32xf32> -> vector<2x32xf32>
      %c0_22 = arith.constant 0 : index
      %c0_23 = arith.constant 0 : index
      %26 = vector.load %arg7[%c0_22, %c0_23] : memref<1x32xf32, #tpu.memory_space<vmem>>, vector<1x32xf32>
      %27 = vector.broadcast %26 : vector<1x32xf32> to vector<2x32xf32>
      %28 = arith.addf %25, %27 : vector<2x32xf32>
      %c0_24 = arith.constant 0 : index
      %c0_25 = arith.constant 0 : index
      %29 = vector.load %arg8[%c0_24, %c0_25] : memref<2x32xf32, #tpu.memory_space<vmem>>, vector<2x32xf32>
      tpu.vector_store %arg8[%c0_24, %c0_25], %28 {strides = array<i32>} : memref<2x32xf32, #tpu.memory_space<vmem>>, vector<2x32xf32>,
    } else {
    }
    return
  }
  func.func @transform_0(%arg0: i32, %arg1: i32) -> (i32, i32, i32) {
    %c0_i32 = arith.constant 0 : i32
    %c0_i32_0 = arith.constant 0 : i32
    return %arg0, %arg1, %c0_i32 : i32, i32, i32
  }
  func.func @transform_1(%arg0: i32, %arg1: i32) -> (i32, i32, i32) {
    %c0_i32 = arith.constant 0 : i32
    %c0_i32_0 = arith.constant 0 : i32
    return %arg0, %arg1, %c0_i32 : i32, i32, i32
  }
  func.func @transform_2(%arg0: i32, %arg1: i32) -> (i32, i32) {
    %c0_i32 = arith.constant 0 : i32
    %c0_i32_0 = arith.constant 0 : i32
    return %arg1, %c0_i32 : i32, i32
  }
  func.func @transform_3(%arg0: i32, %arg1: i32) -> (i32, i32) {
    %c0_i32 = arith.constant 0 : i32
    %c0_i32_0 = arith.constant 0 : i32
    return %arg1, %c0_i32 : i32, i32
  }
  func.func @transform_4(%arg0: i32, %arg1: i32) -> (i32, i32) {
    %c0_i32 = arith.constant 0 : i32
    %c0_i32_0 = arith.constant 0 : i32
    %c0_i32_1 = arith.constant 0 : i32
    return %c0_i32, %c0_i32_0 : i32, i32
  }
  func.func @transform_5(%arg0: i32, %arg1: i32) -> (i32, i32) {
    %c0_i32 = arith.constant 0 : i32
    %c0_i32_0 = arith.constant 0 : i32
    %c0_i32_1 = arith.constant 0 : i32
    return %c0_i32, %c0_i32_0 : i32, i32
  }
  func.func @transform_6(%arg0: i32, %arg1: i32) -> (i32, i32) {
    %c0_i32 = arith.constant 0 : i32
    %c0_i32_0 = arith.constant 0 : i32
    return %arg0, %c0_i32 : i32, i32
  }
}

module attributes {stable_mosaic.version = 11 : i64} {
  func.func @_gate_kernel(%arg0: i32, %arg1: i32, %arg2: memref<2x8x32xf32, #tpu.memory_space<vmem>>, %arg3: memref<2x8x32xf32, #tpu.memory_space<vmem>>, %arg4: memref<8x32xf32, #tpu.memory_space<vmem>>, %arg5: memref<8x32xf32, #tpu.memory_space<vmem>>, %arg6: memref<32x32xf32, #tpu.memory_space<vmem>>, %arg7: memref<1x32xf32, #tpu.memory_space<vmem>>, %arg8: memref<2x32xf32, #tpu.memory_space<vmem>>, %arg9: memref<2x32xf32, #tpu.memory_space<vmem>>) attributes {dimension_semantics = [#tpu.dimension_semantics<parallel>, #tpu.dimension_semantics<arbitrary>], iteration_bounds = array<i64: 1, 1>, scalar_prefetch = 0 : i64, scratch_operands = 1 : i64, tpu.core_type = #tpu.core_type<tc>, window_params = [{transform_indices = @transform_0, window_bounds = array<i64: 2, 8, 32>}, {transform_indices = @transform_1, window_bounds = array<i64: 2, 8, 32>}, {transform_indices = @transform_2, window_bounds = array<i64: 8, 32>}, {transform_indices = @transform_3, window_bounds = array<i64: 8, 32>}, {pipeline_mode = #tpu.pipeline_mode<synchronous>, transform_indices = @transform_4, window_bounds = array<i64: 32, 32>}, {pipeline_mode = #tpu.pipeline_mode<synchronous>, transform_indices = @transform_5, window_bounds = array<i64: 1, 32>}, {transform_indices = @transform_6, window_bounds = array<i64: 2, 32>}]} {
    %c0_i32 = arith.constant 0 : i32
    %0 = arith.cmpi eq, %arg1, %c0_i32 : i32
    %1 = arith.extui %0 : i1 to i32
    %c0_i32_0 = arith.constant 0 : i32
    %2 = arith.cmpi ne, %1, %c0_i32_0 : i32
    scf.if %2 {
      %cst_16 = arith.constant 0.000000e+00 : f32
      %21 = vector.broadcast %cst_16 : f32 to vector<2x32xf32>
      %c0_17 = arith.constant 0 : index
      %c0_18 = arith.constant 0 : index
      %22 = vector.load %arg9[%c0_17, %c0_18] : memref<2x32xf32, #tpu.memory_space<vmem>>, vector<2x32xf32>
      tpu.vector_store %arg9[%c0_17, %c0_18], %21 {strides = array<i32>} : memref<2x32xf32, #tpu.memory_space<vmem>>, vector<2x32xf32>,
    } else {
    }
    %c0 = arith.constant 0 : index
    %c0_1 = arith.constant 0 : index
    %3 = vector.load %arg9[%c0, %c0_1] : memref<2x32xf32, #tpu.memory_space<vmem>>, vector<2x32xf32>
    %c0_2 = arith.constant 0 : index
    %c0_3 = arith.constant 0 : index
    %c0_4 = arith.constant 0 : index
    %4 = vector.load %arg2[%c0_2, %c0_3, %c0_4] : memref<2x8x32xf32, #tpu.memory_space<vmem>>, vector<2x8x32xf32>
    %c0_5 = arith.constant 0 : index
    %c0_6 = arith.constant 0 : index
    %5 = vector.load %arg4[%c0_5, %c0_6] : memref<8x32xf32, #tpu.memory_space<vmem>>, vector<8x32xf32>
    %6 = vector.shape_cast %5 : vector<8x32xf32> to vector<1x8x32xf32>
    %7 = vector.broadcast %6 : vector<1x8x32xf32> to vector<2x8x32xf32>
    %8 = arith.mulf %4, %7 : vector<2x8x32xf32>
    %c0_7 = arith.constant 0 : index
    %c0_8 = arith.constant 0 : index
    %c0_9 = arith.constant 0 : index
    %9 = vector.load %arg3[%c0_7, %c0_8, %c0_9] : memref<2x8x32xf32, #tpu.memory_space<vmem>>, vector<2x8x32xf32>
    %c0_10 = arith.constant 0 : index
    %c0_11 = arith.constant 0 : index
    %10 = vector.load %arg5[%c0_10, %c0_11] : memref<8x32xf32, #tpu.memory_space<vmem>>, vector<8x32xf32>
    %11 = vector.shape_cast %10 : vector<8x32xf32> to vector<1x8x32xf32>
    %12 = vector.broadcast %11 : vector<1x8x32xf32> to vector<2x8x32xf32>
    %13 = arith.mulf %9, %12 : vector<2x8x32xf32>
    %14 = arith.subf %8, %13 : vector<2x8x32xf32>
    %cst = arith.constant dense<0.000000e+00> : vector<2x32xf32>
    %15 = vector.multi_reduction <add>, %14, %cst [1] : vector<2x8x32xf32> to vector<2x32xf32>
    %16 = arith.addf %3, %15 : vector<2x32xf32>
    %c0_12 = arith.constant 0 : index
    %c0_13 = arith.constant 0 : index
    %17 = vector.load %arg9[%c0_12, %c0_13] : memref<2x32xf32, #tpu.memory_space<vmem>>, vector<2x32xf32>
    tpu.vector_store %arg9[%c0_12, %c0_13], %16 {strides = array<i32>} : memref<2x32xf32, #tpu.memory_space<vmem>>, vector<2x32xf32>,
    %c0_i32_14 = arith.constant 0 : i32
    %18 = arith.cmpi eq, %arg1, %c0_i32_14 : i32
    %19 = arith.extui %18 : i1 to i32
    %c0_i32_15 = arith.constant 0 : i32
    %20 = arith.cmpi ne, %19, %c0_i32_15 : i32
    scf.if %20 {
      %c0_16 = arith.constant 0 : index
      %c0_17 = arith.constant 0 : index
      %21 = vector.load %arg9[%c0_16, %c0_17] : memref<2x32xf32, #tpu.memory_space<vmem>>, vector<2x32xf32>
      %cst_18 = arith.constant 1.250000e-01 : f32
      %22 = vector.broadcast %cst_18 : f32 to vector<2x32xf32>
      %23 = arith.mulf %21, %22 : vector<2x32xf32>
      %c0_19 = arith.constant 0 : index
      %c0_20 = arith.constant 0 : index
      %24 = vector.load %arg6[%c0_19, %c0_20] : memref<32x32xf32, #tpu.memory_space<vmem>>, vector<32x32xf32>
      %cst_21 = arith.constant dense<0.000000e+00> : vector<2x32xf32>
      %25 = tpu.matmul %23, %24, %cst_21 {dimension_numbers = #tpu.dot_dimension_numbers<[1], [0], [0], [1], [0, 0, 1, 1], [], []>} : vector<2x32xf32>, vector<32x32xf32>, vector<2x32xf32> -> vector<2x32xf32>
      %c0_22 = arith.constant 0 : index
      %c0_23 = arith.constant 0 : index
      %26 = vector.load %arg7[%c0_22, %c0_23] : memref<1x32xf32, #tpu.memory_space<vmem>>, vector<1x32xf32>
      %27 = vector.broadcast %26 : vector<1x32xf32> to vector<2x32xf32>
      %28 = arith.addf %25, %27 : vector<2x32xf32>
      %c0_24 = arith.constant 0 : index
      %c0_25 = arith.constant 0 : index
      %29 = vector.load %arg8[%c0_24, %c0_25] : memref<2x32xf32, #tpu.memory_space<vmem>>, vector<2x32xf32>
      tpu.vector_store %arg8[%c0_24, %c0_25], %28 {strides = array<i32>} : memref<2x32xf32, #tpu.memory_space<vmem>>, vector<2x32xf32>,
    } else {
    }
    return
  }
  func.func @transform_0(%arg0: i32, %arg1: i32) -> (i32, i32, i32) {
    %c0_i32 = arith.constant 0 : i32
    %c0_i32_0 = arith.constant 0 : i32
    return %arg0, %arg1, %c0_i32 : i32, i32, i32
  }
  func.func @transform_1(%arg0: i32, %arg1: i32) -> (i32, i32, i32) {
    %c0_i32 = arith.constant 0 : i32
    %c0_i32_0 = arith.constant 0 : i32
    return %arg0, %arg1, %c0_i32 : i32, i32, i32
  }
  func.func @transform_2(%arg0: i32, %arg1: i32) -> (i32, i32) {
    %c0_i32 = arith.constant 0 : i32
    %c0_i32_0 = arith.constant 0 : i32
    return %arg1, %c0_i32 : i32, i32
  }
  func.func @transform_3(%arg0: i32, %arg1: i32) -> (i32, i32) {
    %c0_i32 = arith.constant 0 : i32
    %c0_i32_0 = arith.constant 0 : i32
    return %arg1, %c0_i32 : i32, i32
  }
  func.func @transform_4(%arg0: i32, %arg1: i32) -> (i32, i32) {
    %c0_i32 = arith.constant 0 : i32
    %c0_i32_0 = arith.constant 0 : i32
    %c0_i32_1 = arith.constant 0 : i32
    return %c0_i32, %c0_i32_0 : i32, i32
  }
  func.func @transform_5(%arg0: i32, %arg1: i32) -> (i32, i32) {
    %c0_i32 = arith.constant 0 : i32
    %c0_i32_0 = arith.constant 0 : i32
    %c0_i32_1 = arith.constant 0 : i32
    return %c0_i32, %c0_i32_0 : i32, i32
  }
  func.func @transform_6(%arg0: i32, %arg1: i32) -> (i32, i32) {
    %c0_i32 = arith.constant 0 : i32
    %c0_i32_0 = arith.constant 0 : i32
    return %arg0, %c0_i32 : i32, i32
  }
}

</mosaic_0001>

<bundles_post_ra>
// kernel: tpu_custom_call.1
= control target key start
LH: loop header
LB: loop body
LE: loop exit
PB: predicated region body
PF: predicated region fallthrough
CT: control target
= control target key end

     0   :  { %11 = vsyncpa [#allocation4], 0  ;;  %s518_s0 = inlined_call_operand.hbm [shape: f32[2,8,32], index: 0, kind: input, shape index: {}]   ;;  %s519_s1 = inlined_call_operand.hbm [shape: f32[2,8,32], index: 1, kind: input, shape index: {}]   ;;  %s520_s2 = inlined_call_operand.hbm [shape: f32[8,32], index: 2, kind: input, shape index: {}]   ;;  %s521_s3 = inlined_call_operand.vmem [shape: f32[8,32], index: 3, kind: input, shape index: {}]   ;;  %s522_s4 = inlined_call_operand.hbm [shape: f32[32,32], index: 4, kind: input, shape index: {}]   ;;  %s523_s5 = inlined_call_operand.vmem [shape: f32[1,32], index: 5, kind: input, shape index: {}]   ;;  %s524_s6 = inlined_call_operand.hbm [shape: f32[2,32], index: 6, kind: output, shape index: {}]  }
   0x1   :  { %12 = vsyncpa [#allocation7], 0 }
   0x2   :  { %13 = vsyncpa [#allocation10], 0 }
   0x3   :  { %14 = vsyncpa [#allocation5], 0  ;;  %s378_s21 = smov [#allocation6]   ;;  %s379_s23 = smov [#allocation3]  }
   0x4   :  { %s32_s22 = sshll.u32 %s378_s21, 4  ;;  %s20_s24 = sshll.u32 %s379_s23, 4  ;;  %s33_s22 = int_to_ptr.vmem [resolvable:$true] %s32_s22  ;;  %s423_s24 = int_to_ptr.vmem [resolvable:$true] %s20_s24 }
   0x5   :  { %s260_s27 = scalar_lea.hbm %s519_s1, 256 }
   0x6   :  { %p261_p0 = scmp.ne.s32.totalorder %s519_s1, %s260_s27  ;;  %p264_p1 = scmp.lt.u32.totalorder %s260_s27, %s519_s1 }
   0x8   :  { %p266_p2 = pnand %p264_p1, %p261_p0 }
   0xa   :  { %269 = shalt.err (!%p266_p2)
}
   0xb   :  { %s270_s8 = scalar_lea.vmem %s33_s22, 256  ;;  %p275_p4 = scmp.lt.s32.totalorder %s33_s22, %s33_s22 }
   0xc   :  { %p271_p3 = scmp.ne.s32.totalorder %s33_s22, %s270_s8  ;;  %p276_p5 = scmp.lt.s32.totalorder %s270_s8, %s270_s8 }
   0xe   :  { %p277_p6 = por %p276_p5, %p275_p4 }
  0x10   :  { %p278_p7 = pnand %p277_p6, %p271_p3 }
  0x12   :  { %281 = shalt.err (!%p278_p7)
}
  0x13   :  { %s380_s9 = smov 128   ;;  %s381_s10 = smov 8  }
  0x14   :  { %38 = dma.hbm_to_vmem [thread:$0]  %s519_s1, 256, %s33_s22, [#allocation7], %s380_s9, %s380_s9, %s381_s10  }
  0x15   :  { %s282_s15 = scalar_lea.hbm %s518_s0, 256 }
  0x16   :  { %p283_p8 = scmp.ne.s32.totalorder %s518_s0, %s282_s15  ;;  %p286_p9 = scmp.lt.u32.totalorder %s282_s15, %s518_s0 }
  0x18   :  { %p288_p10 = pnand %p286_p9, %p283_p8 }
  0x1a   :  { %291 = shalt.err (!%p288_p10)
}
  0x1b   :  { %s292_s20 = scalar_lea.vmem %s423_s24, 256  ;;  %p297_p12 = scmp.lt.s32.totalorder %s423_s24, %s423_s24 }
  0x1c   :  { %p293_p11 = scmp.ne.s32.totalorder %s423_s24, %s292_s20  ;;  %p298_p13 = scmp.lt.s32.totalorder %s292_s20, %s292_s20 }
  0x1e   :  { %p299_p0 = por %p298_p13, %p297_p12 }
  0x20   :  { %p300_p1 = pnand %p299_p0, %p293_p11 }
  0x22   :  { %303 = shalt.err (!%p300_p1)
}
  0x23   :  { %26 = dma.hbm_to_vmem [thread:$0]  %s518_s0, 256, %s423_s24, [#allocation4], %s380_s9, %s380_s9, %s381_s10  }
  0x24   :  { %s382_s22 = smov [#allocation8]   ;;  %s383_s25 = smov [#allocation9]  }
  0x25   :  { %s45_s23 = sshll.u32 %s382_s22, 4  ;;  %s56_s26 = sshll.u32 %s383_s25, 4  ;;  %s46_s23 = int_to_ptr.vmem [resolvable:$true] %s45_s23  ;;  %s460_s26 = int_to_ptr.vmem [resolvable:$true] %s56_s26 }
  0x26   :  { %s304_s29 = scalar_lea.hbm %s520_s2, 128 }
  0x27   :  { %p305_p2 = scmp.ne.s32.totalorder %s520_s2, %s304_s29  ;;  %p308_p3 = scmp.lt.u32.totalorder %s304_s29, %s520_s2 }
  0x29   :  { %p310_p4 = pnand %p308_p3, %p305_p2 }
  0x2b   :  { %313 = shalt.err (!%p310_p4)
}
  0x2c   :  { %s314_s0 = scalar_lea.vmem %s46_s23, 128  ;;  %p319_p6 = scmp.lt.s32.totalorder %s46_s23, %s46_s23 }
  0x2d   :  { %p315_p5 = scmp.ne.s32.totalorder %s46_s23, %s314_s0  ;;  %p320_p7 = scmp.lt.s32.totalorder %s314_s0, %s314_s0 }
  0x2f   :  { %p321_p8 = por %p320_p7, %p319_p6 }
  0x31   :  { %p322_p9 = pnand %p321_p8, %p315_p5 }
  0x33   :  { %325 = shalt.err (!%p322_p9)
}
  0x34   :  { %48 = dma.hbm_to_vmem [thread:$0]  %s520_s2, 128, %s46_s23, [#allocation7]  }
  0x35   :  { %s326_s15 = scalar_lea.hbm %s522_s4, 512 }
  0x36   :  { %p327_p10 = scmp.ne.s32.totalorder %s522_s4, %s326_s15  ;;  %p330_p11 = scmp.lt.u32.totalorder %s326_s15, %s522_s4 }
  0x38   :  { %p332_p12 = pnand %p330_p11, %p327_p10 }
  0x3a   :  { %335 = shalt.err (!%p332_p12)
}
  0x3b   :  { %s336_s20 = scalar_lea.vmem %s460_s26, 512  ;;  %p341_p0 = scmp.lt.s32.totalorder %s460_s26, %s460_s26 }
  0x3c   :  { %p337_p13 = scmp.ne.s32.totalorder %s460_s26, %s336_s20  ;;  %p342_p1 = scmp.lt.s32.totalorder %s336_s20, %s336_s20 }
  0x3e   :  { %p343_p2 = por %p342_p1, %p341_p0 }
  0x40   :  { %p344_p3 = pnand %p343_p2, %p337_p13 }
  0x42   :  { %347 = shalt.err (!%p344_p3)
}
  0x43   :  { %62 = dma.hbm_to_vmem [thread:$0]  %s522_s4, 512, %s460_s26, [#allocation10], %s380_s9, %s380_s9, %s381_s10  }
  0x44   :  { %370 = dma.done.wait [#allocation4], 256  }
  0x45   :  { %371 = vsyncadd [#allocation4], 4294967040 }
  0x46   :  { %372 = dma.done.wait [#allocation7], 384  }
  0x47   :  { %373 = vsyncadd [#allocation7], 4294966912 }
  0x48   :  { %374 = dma.done.wait [#allocation10], 512  }
  0x49   :  { %375 = vsyncadd [#allocation10], 4294966784  ;;  %vm81_vm0 = vcmask 254976   ;;  %v384_v0 = vmov 0.0|0.0   ;;  %v385_v1 = vmov 0.0   ;;  %vm386_vm1 = vmmov 0  }
  0x4a   :  { %244 = vmatprep.subr.bf16.mxu0 %v384_v0  ;;  %82 = vst.msk [vmem:[#allocation2] sm:$0x3] %vm81_vm0, %v385_v1  ;;  %241 = vmatprep.mubr.msk.f32.mxu0 %vm386_vm1, %v385_v1  ;;  %v124_v2 = vld [vmem:[#allocation9] sm:$0xff]  ;;  %v125_v3 = vld [vmem:[#allocation9 + $0x8] sm:$0xff]  ;;  %v126_v4 = vld [vmem:[#allocation9 + $0x10] sm:$0xff]  ;;  %vm96_vm2 = vcmask 261120  }
  0x4b   :  { %v245_v5 = vpack.c.bf16 %v125_v3, %v124_v2  ;;  %v127_v6 = vld [vmem:[#allocation9 + $0x18] sm:$0xff]  ;;  %v85_v8 = vld [vmem:[#allocation3 + $0x8] sm:$0xff]  ;;  %v89_v10 = vld [vmem:[#allocation6] sm:$0xff]  ;;  %vm113_vm3 = vcmask 1041409   ;;  %s387_s21 = smov [#allocation11]  }
  0x4c   :  { %v84_v7 = vld [vmem:[#allocation3] sm:$0xff]  ;;  %v248_v11 = vpack.c.bf16 %v127_v6, %v126_v4  ;;  %v90_v14 = vld [vmem:[#allocation6 + $0x8] sm:$0xff]  ;;  %s215_s22 = sshll.u32 %s387_s21, 4  ;;  %s216_s22 = int_to_ptr.vmem [resolvable:$true] %s215_s22 }
  0x4d   :  { %v86_v9 = vld [vmem:[#allocation8] sm:$0xff]  ;;  %246 = vmatpush3.bf16.msra.mxu0 %v245_v5  ;;  %v226_v39 = vld [vmem:[%s523_s5] ss:$0 sm:$0xff]  ;;  %s348_s23 = scalar_lea.vmem %s216_s22, 32  ;;  %p353_p5 = scmp.lt.s32.totalorder %s216_s22, %s216_s22 }
  0x4e   :  { %v87_v12 = vmul.f32 %v86_v9, %v84_v7  ;;  %v88_v13 = vmul.f32 %v86_v9, %v85_v8  ;;  %v91_v15 = vld [vmem:[%s521_s3] sm:$0xff]  ;;  %247 = vmatprep.subr.bf16.mxu0 %v384_v0  ;;  %p349_p4 = scmp.ne.s32.totalorder %s216_s22, %s348_s23  ;;  %p354_p6 = scmp.lt.s32.totalorder %s348_s23, %s348_s23 }
  0x4f   :  { %v92_v16 = vmul.f32 %v91_v15, %v89_v10  ;;  %v93_v17 = vmul.f32 %v91_v15, %v90_v14 }
  0x50   :  { %p355_p7 = por %p354_p6, %p353_p5 }
  0x51   :  { %v94_v18 = vsub.f32 %v87_v12, %v92_v16  ;;  %v95_v19 = vsub.f32 %v88_v13, %v93_v17  ;;  %249 = vmatpush3.bf16.msra.mxu0 %v248_v11  ;;  %v83_v32 = vld [vmem:[#allocation2] sm:$0x3] }
  0x52   :  { %p356_p8 = pnand %p355_p7, %p349_p4 }
  0x53   :  { %v97_v20 = vsel %vm96_vm2, %v94_v18, 0.0  ;;  %v104_v21 = vsel %vm96_vm2, %v95_v19, 0.0 }
  0x54   :  { %v98_v22 = vrot.slane %v97_v20, 4  ;;  %v105_v23 = vrot.slane %v104_v21, 4 }
  0x56   :  { %v99_v24 = vadd.f32 %v98_v22, %v97_v20  ;;  %v106_v25 = vadd.f32 %v105_v23, %v104_v21 }
  0x58   :  { %v100_v26 = vrot.slane %v99_v24, 2  ;;  %v107_v27 = vrot.slane %v106_v25, 2 }
  0x5a   :  { %v101_v28 = vadd.f32 %v100_v26, %v99_v24  ;;  %v108_v29 = vadd.f32 %v107_v27, %v106_v25 }
  0x5c   :  { %v102_v30 = vrot.slane %v101_v28, 1  ;;  %v109_v31 = vrot.slane %v108_v29, 1 }
  0x5e   :  { %v103_v33 = vadd.f32 %v102_v30, %v101_v28  ;;  %v110_v34 = vadd.f32 %v109_v31, %v108_v29 }
  0x60   :  { %v114_v35 = vsel %vm113_vm3, %v110_v34, %v103_v33 }
  0x61   :  { %v116_v36 = vadd.f32 %v114_v35, %v83_v32 }
  0x63   :  { %118 = vst.msk [vmem:[#allocation2] sm:$0x3] %vm81_vm0, %v116_v36 }
  0x6a   :  { %v122_v37 = vld [vmem:[#allocation2] sm:$0x3] }
  0x6b   :  { %v123_v38 = vmul.f32 0.125, %v122_v37 }
  0x6d   :  { %242 = vmatmul.mubr.msk.f32.vlgmr.msra.gmra.mrb[0].mxu0 %vm96_vm2, %v123_v38 }
 0x140   :  { %v204_v40 = vpop.f32.mrb[0].mxu0 }
 0x141   :  { %v205_v41 = vadd.f32 %v226_v39, %v204_v40  ;;  %v243_v42 = vpop.f32.mrb[1].mxu0 }
 0x143   :  { %208 = vst.msk [vmem:[#allocation11] sm:$0x3] %vm81_vm0, %v205_v41 }
 0x144   :  { %359 = shalt.err (!%p356_p8)
}
 0x145   :  { %s360_s27 = scalar_lea.hbm %s524_s6, 32 }
 0x146   :  { %p361_p9 = scmp.ne.s32.totalorder %s524_s6, %s360_s27  ;;  %p364_p10 = scmp.lt.u32.totalorder %s360_s27, %s524_s6 }
 0x148   :  { %p366_p11 = pnand %p364_p10, %p361_p9 }
 0x14a   :  { %369 = shalt.err (!%p366_p11)
}
 0x14b   :  { %218 = dma.vmem_to_hbm [thread:$0]  %s216_s22, 32, %s524_s6, [#allocation5]  }
 0x14c   :  { %376 = dma.done.wait [#allocation5], 32  }
 0x14d   :  { %377 = vsyncadd [#allocation5], 4294967264 }
 0x14e   :  { %222 = vsyncpa [#allocation4], 1 }
 0x14f   :  { %223 = vsyncpa [#allocation7], 1 }
 0x150   :  { %224 = vsyncpa [#allocation10], 1 }
 0x151   :  { %225 = vsyncpa [#allocation5], 1 }

// kernel: tpu_custom_call.1
= control target key start
LH: loop header
LB: loop body
LE: loop exit
PB: predicated region body
PF: predicated region fallthrough
CT: control target
= control target key end

     0   :  { %11 = vsyncpa [#allocation4], 0  ;;  %s518_s0 = inlined_call_operand.hbm [shape: f32[2,8,32], index: 0, kind: input, shape index: {}]   ;;  %s519_s1 = inlined_call_operand.hbm [shape: f32[2,8,32], index: 1, kind: input, shape index: {}]   ;;  %s520_s2 = inlined_call_operand.hbm [shape: f32[8,32], index: 2, kind: input, shape index: {}]   ;;  %s521_s3 = inlined_call_operand.vmem [shape: f32[8,32], index: 3, kind: input, shape index: {}]   ;;  %s522_s4 = inlined_call_operand.hbm [shape: f32[32,32], index: 4, kind: input, shape index: {}]   ;;  %s523_s5 = inlined_call_operand.vmem [shape: f32[1,32], index: 5, kind: input, shape index: {}]   ;;  %s524_s6 = inlined_call_operand.hbm [shape: f32[2,32], index: 6, kind: output, shape index: {}]  }
   0x1   :  { %12 = vsyncpa [#allocation7], 0 }
   0x2   :  { %13 = vsyncpa [#allocation10], 0 }
   0x3   :  { %14 = vsyncpa [#allocation5], 0  ;;  %s378_s21 = smov [#allocation6]   ;;  %s379_s23 = smov [#allocation3]  }
   0x4   :  { %s32_s22 = sshll.u32 %s378_s21, 4  ;;  %s20_s24 = sshll.u32 %s379_s23, 4  ;;  %s33_s22 = int_to_ptr.vmem [resolvable:$true] %s32_s22  ;;  %s423_s24 = int_to_ptr.vmem [resolvable:$true] %s20_s24 }
   0x5   :  { %s260_s27 = scalar_lea.hbm %s519_s1, 256 }
   0x6   :  { %p261_p0 = scmp.ne.s32.totalorder %s519_s1, %s260_s27  ;;  %p264_p1 = scmp.lt.u32.totalorder %s260_s27, %s519_s1 }
   0x8   :  { %p266_p2 = pnand %p264_p1, %p261_p0 }
   0xa   :  { %269 = shalt.err (!%p266_p2)
}
   0xb   :  { %s270_s8 = scalar_lea.vmem %s33_s22, 256  ;;  %p275_p4 = scmp.lt.s32.totalorder %s33_s22, %s33_s22 }
   0xc   :  { %p271_p3 = scmp.ne.s32.totalorder %s33_s22, %s270_s8  ;;  %p276_p5 = scmp.lt.s32.totalorder %s270_s8, %s270_s8 }
   0xe   :  { %p277_p6 = por %p276_p5, %p275_p4 }
  0x10   :  { %p278_p7 = pnand %p277_p6, %p271_p3 }
  0x12   :  { %281 = shalt.err (!%p278_p7)
}
  0x13   :  { %s380_s9 = smov 128   ;;  %s381_s10 = smov 8  }
  0x14   :  { %38 = dma.hbm_to_vmem [thread:$0]  %s519_s1, 256, %s33_s22, [#allocation7], %s380_s9, %s380_s9, %s381_s10  }
  0x15   :  { %s282_s15 = scalar_lea.hbm %s518_s0, 256 }
  0x16   :  { %p283_p8 = scmp.ne.s32.totalorder %s518_s0, %s282_s15  ;;  %p286_p9 = scmp.lt.u32.totalorder %s282_s15, %s518_s0 }
  0x18   :  { %p288_p10 = pnand %p286_p9, %p283_p8 }
  0x1a   :  { %291 = shalt.err (!%p288_p10)
}
  0x1b   :  { %s292_s20 = scalar_lea.vmem %s423_s24, 256  ;;  %p297_p12 = scmp.lt.s32.totalorder %s423_s24, %s423_s24 }
  0x1c   :  { %p293_p11 = scmp.ne.s32.totalorder %s423_s24, %s292_s20  ;;  %p298_p13 = scmp.lt.s32.totalorder %s292_s20, %s292_s20 }
  0x1e   :  { %p299_p0 = por %p298_p13, %p297_p12 }
  0x20   :  { %p300_p1 = pnand %p299_p0, %p293_p11 }
  0x22   :  { %303 = shalt.err (!%p300_p1)
}
  0x23   :  { %26 = dma.hbm_to_vmem [thread:$0]  %s518_s0, 256, %s423_s24, [#allocation4], %s380_s9, %s380_s9, %s381_s10  }
  0x24   :  { %s382_s22 = smov [#allocation8]   ;;  %s383_s25 = smov [#allocation9]  }
  0x25   :  { %s45_s23 = sshll.u32 %s382_s22, 4  ;;  %s56_s26 = sshll.u32 %s383_s25, 4  ;;  %s46_s23 = int_to_ptr.vmem [resolvable:$true] %s45_s23  ;;  %s460_s26 = int_to_ptr.vmem [resolvable:$true] %s56_s26 }
  0x26   :  { %s304_s29 = scalar_lea.hbm %s520_s2, 128 }
  0x27   :  { %p305_p2 = scmp.ne.s32.totalorder %s520_s2, %s304_s29  ;;  %p308_p3 = scmp.lt.u32.totalorder %s304_s29, %s520_s2 }
  0x29   :  { %p310_p4 = pnand %p308_p3, %p305_p2 }
  0x2b   :  { %313 = shalt.err (!%p310_p4)
}
  0x2c   :  { %s314_s0 = scalar_lea.vmem %s46_s23, 128  ;;  %p319_p6 = scmp.lt.s32.totalorder %s46_s23, %s46_s23 }
  0x2d   :  { %p315_p5 = scmp.ne.s32.totalorder %s46_s23, %s314_s0  ;;  %p320_p7 = scmp.lt.s32.totalorder %s314_s0, %s314_s0 }
  0x2f   :  { %p321_p8 = por %p320_p7, %p319_p6 }
  0x31   :  { %p322_p9 = pnand %p321_p8, %p315_p5 }
  0x33   :  { %325 = shalt.err (!%p322_p9)
}
  0x34   :  { %48 = dma.hbm_to_vmem [thread:$0]  %s520_s2, 128, %s46_s23, [#allocation7]  }
  0x35   :  { %s326_s15 = scalar_lea.hbm %s522_s4, 512 }
  0x36   :  { %p327_p10 = scmp.ne.s32.totalorder %s522_s4, %s326_s15  ;;  %p330_p11 = scmp.lt.u32.totalorder %s326_s15, %s522_s4 }
  0x38   :  { %p332_p12 = pnand %p330_p11, %p327_p10 }
  0x3a   :  { %335 = shalt.err (!%p332_p12)
}
  0x3b   :  { %s336_s20 = scalar_lea.vmem %s460_s26, 512  ;;  %p341_p0 = scmp.lt.s32.totalorder %s460_s26, %s460_s26 }
  0x3c   :  { %p337_p13 = scmp.ne.s32.totalorder %s460_s26, %s336_s20  ;;  %p342_p1 = scmp.lt.s32.totalorder %s336_s20, %s336_s20 }
  0x3e   :  { %p343_p2 = por %p342_p1, %p341_p0 }
  0x40   :  { %p344_p3 = pnand %p343_p2, %p337_p13 }
  0x42   :  { %347 = shalt.err (!%p344_p3)
}
  0x43   :  { %62 = dma.hbm_to_vmem [thread:$0]  %s522_s4, 512, %s460_s26, [#allocation10], %s380_s9, %s380_s9, %s381_s10  }
  0x44   :  { %370 = dma.done.wait [#allocation4], 256  }
  0x45   :  { %371 = vsyncadd [#allocation4], 4294967040 }
  0x46   :  { %372 = dma.done.wait [#allocation7], 384  }
  0x47   :  { %373 = vsyncadd [#allocation7], 4294966912 }
  0x48   :  { %374 = dma.done.wait [#allocation10], 512  }
  0x49   :  { %375 = vsyncadd [#allocation10], 4294966784  ;;  %vm81_vm0 = vcmask 254976   ;;  %v384_v0 = vmov 0.0|0.0   ;;  %v385_v1 = vmov 0.0   ;;  %vm386_vm1 = vmmov 0  }
  0x4a   :  { %244 = vmatprep.subr.bf16.mxu0 %v384_v0  ;;  %82 = vst.msk [vmem:[#allocation2] sm:$0x3] %vm81_vm0, %v385_v1  ;;  %241 = vmatprep.mubr.msk.f32.mxu0 %vm386_vm1, %v385_v1  ;;  %v124_v2 = vld [vmem:[#allocation9] sm:$0xff]  ;;  %v125_v3 = vld [vmem:[#allocation9 + $0x8] sm:$0xff]  ;;  %v126_v4 = vld [vmem:[#allocation9 + $0x10] sm:$0xff]  ;;  %vm96_vm2 = vcmask 261120  }
  0x4b   :  { %v245_v5 = vpack.c.bf16 %v125_v3, %v124_v2  ;;  %v127_v6 = vld [vmem:[#allocation9 + $0x18] sm:$0xff]  ;;  %v85_v8 = vld [vmem:[#allocation3 + $0x8] sm:$0xff]  ;;  %v89_v10 = vld [vmem:[#allocation6] sm:$0xff]  ;;  %vm113_vm3 = vcmask 1041409   ;;  %s387_s21 = smov [#allocation11]  }
  0x4c   :  { %v84_v7 = vld [vmem:[#allocation3] sm:$0xff]  ;;  %v248_v11 = vpack.c.bf16 %v127_v6, %v126_v4  ;;  %v90_v14 = vld [vmem:[#allocation6 + $0x8] sm:$0xff]  ;;  %s215_s22 = sshll.u32 %s387_s21, 4  ;;  %s216_s22 = int_to_ptr.vmem [resolvable:$true] %s215_s22 }
  0x4d   :  { %v86_v9 = vld [vmem:[#allocation8] sm:$0xff]  ;;  %246 = vmatpush3.bf16.msra.mxu0 %v245_v5  ;;  %v226_v39 = vld [vmem:[%s523_s5] ss:$0 sm:$0xff]  ;;  %s348_s23 = scalar_lea.vmem %s216_s22, 32  ;;  %p353_p5 = scmp.lt.s32.totalorder %s216_s22, %s216_s22 }
  0x4e   :  { %v87_v12 = vmul.f32 %v86_v9, %v84_v7  ;;  %v88_v13 = vmul.f32 %v86_v9, %v85_v8  ;;  %v91_v15 = vld [vmem:[%s521_s3] sm:$0xff]  ;;  %247 = vmatprep.subr.bf16.mxu0 %v384_v0  ;;  %p349_p4 = scmp.ne.s32.totalorder %s216_s22, %s348_s23  ;;  %p354_p6 = scmp.lt.s32.totalorder %s348_s23, %s348_s23 }
  0x4f   :  { %v92_v16 = vmul.f32 %v91_v15, %v89_v10  ;;  %v93_v17 = vmul.f32 %v91_v15, %v90_v14 }
  0x50   :  { %p355_p7 = por %p354_p6, %p353_p5 }
  0x51   :  { %v94_v18 = vsub.f32 %v87_v12, %v92_v16  ;;  %v95_v19 = vsub.f32 %v88_v13, %v93_v17  ;;  %249 = vmatpush3.bf16.msra.mxu0 %v248_v11  ;;  %v83_v32 = vld [vmem:[#allocation2] sm:$0x3] }
  0x52   :  { %p356_p8 = pnand %p355_p7, %p349_p4 }
  0x53   :  { %v97_v20 = vsel %vm96_vm2, %v94_v18, 0.0  ;;  %v104_v21 = vsel %vm96_vm2, %v95_v19, 0.0 }
  0x54   :  { %v98_v22 = vrot.slane %v97_v20, 4  ;;  %v105_v23 = vrot.slane %v104_v21, 4 }
  0x56   :  { %v99_v24 = vadd.f32 %v98_v22, %v97_v20  ;;  %v106_v25 = vadd.f32 %v105_v23, %v104_v21 }
  0x58   :  { %v100_v26 = vrot.slane %v99_v24, 2  ;;  %v107_v27 = vrot.slane %v106_v25, 2 }
  0x5a   :  { %v101_v28 = vadd.f32 %v100_v26, %v99_v24  ;;  %v108_v29 = vadd.f32 %v107_v27, %v106_v25 }
  0x5c   :  { %v102_v30 = vrot.slane %v101_v28, 1  ;;  %v109_v31 = vrot.slane %v108_v29, 1 }
  0x5e   :  { %v103_v33 = vadd.f32 %v102_v30, %v101_v28  ;;  %v110_v34 = vadd.f32 %v109_v31, %v108_v29 }
  0x60   :  { %v114_v35 = vsel %vm113_vm3, %v110_v34, %v103_v33 }
  0x61   :  { %v116_v36 = vadd.f32 %v114_v35, %v83_v32 }
  0x63   :  { %118 = vst.msk [vmem:[#allocation2] sm:$0x3] %vm81_vm0, %v116_v36 }
  0x6a   :  { %v122_v37 = vld [vmem:[#allocation2] sm:$0x3] }
  0x6b   :  { %v123_v38 = vmul.f32 0.125, %v122_v37 }
  0x6d   :  { %242 = vmatmul.mubr.msk.f32.vlgmr.msra.gmra.mrb[0].mxu0 %vm96_vm2, %v123_v38 }
 0x140   :  { %v204_v40 = vpop.f32.mrb[0].mxu0 }
 0x141   :  { %v205_v41 = vadd.f32 %v226_v39, %v204_v40  ;;  %v243_v42 = vpop.f32.mrb[1].mxu0 }
 0x143   :  { %208 = vst.msk [vmem:[#allocation11] sm:$0x3] %vm81_vm0, %v205_v41 }
 0x144   :  { %359 = shalt.err (!%p356_p8)
}
 0x145   :  { %s360_s27 = scalar_lea.hbm %s524_s6, 32 }
 0x146   :  { %p361_p9 = scmp.ne.s32.totalorder %s524_s6, %s360_s27  ;;  %p364_p10 = scmp.lt.u32.totalorder %s360_s27, %s524_s6 }
 0x148   :  { %p366_p11 = pnand %p364_p10, %p361_p9 }
 0x14a   :  { %369 = shalt.err (!%p366_p11)
}
 0x14b   :  { %218 = dma.vmem_to_hbm [thread:$0]  %s216_s22, 32, %s524_s6, [#allocation5]  }
 0x14c   :  { %376 = dma.done.wait [#allocation5], 32  }
 0x14d   :  { %377 = vsyncadd [#allocation5], 4294967264 }
 0x14e   :  { %222 = vsyncpa [#allocation4], 1 }
 0x14f   :  { %223 = vsyncpa [#allocation7], 1 }
 0x150   :  { %224 = vsyncpa [#allocation10], 1 }
 0x151   :  { %225 = vsyncpa [#allocation5], 1 }

</bundles_post_ra>
